<compile_context>
chip_gen: v5e
topology: v5e:2x2
jax: 0.10.0
libtpu: 0.0.40
codegen_flags: <defaults>
</compile_context>

<pallas_src>
import functools

import jax
import jax.numpy as jnp
from jax import lax
from jax.experimental import pallas as pl
from jax.experimental.pallas import tpu as pltpu


def _round_up(n, m=128):
    return ((n + m - 1) // m) * m


# ---------------------------------------------------------------------------
# Kernel: whole T-step LSTM (PyTorch gate order i,f,g,o) + decoder Linear,
# executed in a single grid step.  Weights, inputs and outputs are resident
# in VMEM for the whole call.
# ---------------------------------------------------------------------------
def _lstm_seq_decode_kernel(x_ref, h0_ref, c0_ref,
                            w_ih_ref, w_hh_ref, b_ref, wdec_ref, bdec_ref,
                            o_ref, h_out_ref, c_out_ref,
                            gx_sc, h_all_sc):
    T = x_ref.shape[0]
    HP = h0_ref.shape[-1]                   # padded hidden size (multiple of 128)

    # 1) Hoisted input projection for ALL steps: (T, I_P) @ (I_P, 4*H_P) + bias.
    gx_sc[...] = (jnp.dot(x_ref[...], w_ih_ref[...],
                          preferred_element_type=jnp.float32) + b_ref[...])

    # 2) Serial recurrence; h/c carried as (1, H_P) values, h_t stored to scratch.
    def step(t, carry):
        h, c = carry
        gates = (gx_sc[pl.ds(t, 1), :] +
                 jnp.dot(h, w_hh_ref[...], preferred_element_type=jnp.float32))
        i_g = jax.nn.sigmoid(gates[:, 0 * HP:1 * HP])
        f_g = jax.nn.sigmoid(gates[:, 1 * HP:2 * HP])
        g_g = jnp.tanh(gates[:, 2 * HP:3 * HP])
        o_g = jax.nn.sigmoid(gates[:, 3 * HP:4 * HP])
        c_new = f_g * c + i_g * g_g
        h_new = o_g * jnp.tanh(c_new)
        h_all_sc[pl.ds(t, 1), :] = h_new
        return h_new, c_new

    h_fin, c_fin = lax.fori_loop(0, T, step, (h0_ref[...], c0_ref[...]),
                                 unroll=True)

    # 3) Final hidden state written once (not per step).
    h_out_ref[...] = h_fin
    c_out_ref[...] = c_fin

    # 4) Deferred decoder: one M=T matmul + one lane-dense (T, O_P) store.
    o_ref[...] = (jnp.dot(h_all_sc[...], wdec_ref[...],
                          preferred_element_type=jnp.float32) + bdec_ref[...])


# ---------------------------------------------------------------------------
# Parameter construction (PyTorch layouts) + packing/padding for the kernel.
# ---------------------------------------------------------------------------
def make_params(key, input_size, hidden_size, output_size):
    """Deterministic synthetic parameters with nn.LSTM / nn.Linear layouts."""
    k = jax.random.split(key, 6)
    H = hidden_size
    w_ih = jax.random.normal(k[0], (4 * H, input_size), jnp.float32) * 0.1
    w_hh = jax.random.normal(k[1], (4 * H, H), jnp.float32) * 0.1
    b_ih = jax.random.normal(k[2], (4 * H,), jnp.float32) * 0.1
    b_hh = jax.random.normal(k[3], (4 * H,), jnp.float32) * 0.1
    w_dec = jax.random.normal(k[4], (output_size, H), jnp.float32) * 0.1
    b_dec = jax.random.normal(k[5], (output_size,), jnp.float32) * 0.1
    return (w_ih, w_hh, b_ih, b_hh, w_dec, b_dec)


def prepare_params(params, input_size, hidden_size, output_size):
    """Pad every feature dim to a multiple of 128; store weights pre-transposed
    for x @ W.  W_ih / W_hh are kept separate (x-projection is hoisted)."""
    w_ih, w_hh, b_ih, b_hh, w_dec, b_dec = params
    H = hidden_size
    I_P = _round_up(input_size)
    H_P = _round_up(hidden_size)
    O_P = _round_up(output_size)

    w_ih_p = jnp.zeros((I_P, 4 * H_P), jnp.float32)
    w_hh_p = jnp.zeros((H_P, 4 * H_P), jnp.float32)
    b_g = jnp.zeros((1, 4 * H_P), jnp.float32)
    for g in range(4):                                    # torch gate order i,f,g,o
        w_ih_p = w_ih_p.at[:input_size, g * H_P:g * H_P + H].set(
            w_ih[g * H:(g + 1) * H, :].T)
        w_hh_p = w_hh_p.at[:H, g * H_P:g * H_P + H].set(
            w_hh[g * H:(g + 1) * H, :].T)
        b_g = b_g.at[0, g * H_P:g * H_P + H].set(
            b_ih[g * H:(g + 1) * H] + b_hh[g * H:(g + 1) * H])

    w_dec_p = jnp.zeros((H_P, O_P), jnp.float32).at[:H, :output_size].set(w_dec.T)
    b_dec_p = jnp.zeros((1, O_P), jnp.float32).at[0, :output_size].set(b_dec)
    return (w_ih_p, w_hh_p, b_g, w_dec_p, b_dec_p)


# ---------------------------------------------------------------------------
# Wrappers
# ---------------------------------------------------------------------------
@functools.partial(jax.jit, static_argnames=("output_size",))
def rnn_forward_seq(xs, hidden, kparams, *, output_size):
    """xs: (T, input_size); hidden: (h0, c0) each (1,1,H).
    Runs T LSTM steps + decoder in ONE pallas_call (single grid step).
    Returns (outputs (T, output_size), (hT, cT) each (1,1,H))."""
    w_ih_p, w_hh_p, b_g, w_dec_p, b_dec_p = kparams
    I_P, G4 = w_ih_p.shape
    H_P = w_hh_p.shape[0]
    O_P = w_dec_p.shape[-1]

    h0, c0 = hidden
    H = h0.shape[-1]
    T, in_size = xs.shape

    x_pad = jnp.zeros((T, I_P), jnp.float32).at[:, :in_size].set(
        xs.astype(jnp.float32))
    h_pad = jnp.zeros((1, H_P), jnp.float32).at[:, :H].set(
        h0.reshape(1, H).astype(jnp.float32))
    c_pad = jnp.zeros((1, H_P), jnp.float32).at[:, :H].set(
        c0.reshape(1, H).astype(jnp.float32))

    out_p, h_new_p, c_new_p = pl.pallas_call(
        _lstm_seq_decode_kernel,
        out_shape=(
            jax.ShapeDtypeStruct((T, O_P), jnp.float32),
            jax.ShapeDtypeStruct((1, H_P), jnp.float32),
            jax.ShapeDtypeStruct((1, H_P), jnp.float32),
        ),
        grid=(1,),
        in_specs=[
            pl.BlockSpec((T, I_P), lambda i: (0, 0)),       # x (whole sequence)
            pl.BlockSpec((1, H_P), lambda i: (0, 0)),       # h0
            pl.BlockSpec((1, H_P), lambda i: (0, 0)),       # c0
            pl.BlockSpec((I_P, G4), lambda i: (0, 0)),      # W_ih^T (padded)
            pl.BlockSpec((H_P, G4), lambda i: (0, 0)),      # W_hh^T (padded)
            pl.BlockSpec((1, G4), lambda i: (0, 0)),        # b_ih + b_hh
            pl.BlockSpec((H_P, O_P), lambda i: (0, 0)),     # decoder W^T
            pl.BlockSpec((1, O_P), lambda i: (0, 0)),       # decoder bias
        ],
        out_specs=(
            pl.BlockSpec((T, O_P), lambda i: (0, 0)),       # all step outputs
            pl.BlockSpec((1, H_P), lambda i: (0, 0)),       # final h
            pl.BlockSpec((1, H_P), lambda i: (0, 0)),       # final c
        ),
        scratch_shapes=[pltpu.VMEM((T, G4), jnp.float32),   # hoisted x-projection
                        pltpu.VMEM((T, H_P), jnp.float32)], # per-step h_t
        input_output_aliases={1: 1, 2: 2},                  # h0->hT, c0->cT
        compiler_params=pltpu.CompilerParams(
            dimension_semantics=("arbitrary",)),
    )(x_pad, h_pad, c_pad, w_ih_p, w_hh_p, b_g, w_dec_p, b_dec_p)

    out = out_p[:, :output_size]                            # (T, output_size)
    h_new = h_new_p[:, :H].reshape(1, 1, H)
    c_new = c_new_p[:, :H].reshape(1, 1, H)
    return out, (h_new, c_new)


def rnn_forward(x, hidden, kparams, *, output_size):
    """Module-equivalent single-step forward: x (input_size,), hidden (h0, c0).
    Returns (output (1, output_size), (h1, c1))."""
    out, hidden = rnn_forward_seq(x.reshape(1, -1), hidden, kparams,
                                  output_size=output_size)
    return out, hidden


# ---------------------------------------------------------------------------
# Pure-JAX reference matching PyTorch LSTM + Linear semantics (one step).
# ---------------------------------------------------------------------------
def _ref_forward(x, hidden, params):
    w_ih, w_hh, b_ih, b_hh, w_dec, b_dec = params
    h0, c0 = hidden
    H = h0.shape[-1]
    x2 = x.reshape(1, -1)
    h = h0.reshape(1, H)
    c = c0.reshape(1, H)
    gates = x2 @ w_ih.T + h @ w_hh.T + b_ih + b_hh
    i = jax.nn.sigmoid(gates[:, 0 * H:1 * H])
    f = jax.nn.sigmoid(gates[:, 1 * H:2 * H])
    g = jnp.tanh(gates[:, 2 * H:3 * H])
    o = jax.nn.sigmoid(gates[:, 3 * H:4 * H])
    c_new = f * c + i * g
    h_new = o * jnp.tanh(c_new)
    out = h_new @ w_dec.T + b_dec
    return out, (h_new.reshape(1, 1, H), c_new.reshape(1, 1, H))


if __name__ == "__main__":
    input_size, hidden_size, output_size = 32, 32, 16

    key = jax.random.PRNGKey(0)
    kp, kx, ks = jax.random.split(key, 3)
    raw_params = make_params(kp, input_size, hidden_size, output_size)
    kparams = prepare_params(raw_params, input_size, hidden_size, output_size)

    # --- module-equivalent single-step forward (T = 1) -----------------------
    x = jax.random.normal(kx, (input_size,), jnp.float32)
    hidden = (jnp.zeros((1, 1, hidden_size), jnp.float32),   # init_hidden()
              jnp.zeros((1, 1, hidden_size), jnp.float32))

    out, (h1, c1) = rnn_forward(x, hidden, kparams, output_size=output_size)
    jax.block_until_ready((out, h1, c1))

    out_ref, (h_ref, c_ref) = _ref_forward(x, hidden, raw_params)
    assert out.shape == (1, output_size)
    assert h1.shape == (1, 1, hidden_size) and c1.shape == (1, 1, hidden_size)
    # Tolerances allow for MXU reduced-precision f32 passes across generations.
    assert jnp.allclose(out, out_ref, atol=2e-3), float(jnp.abs(out - out_ref).max())
    assert jnp.allclose(h1, h_ref, atol=2e-3)
    assert jnp.allclose(c1, c_ref, atol=2e-3)

    # --- full sequence fused into a single pallas_call (single grid step) ----
    T = 8
    xs = jax.random.normal(ks, (T, input_size), jnp.float32)
    outs, (hT, cT) = rnn_forward_seq(xs, hidden, kparams, output_size=output_size)
    jax.block_until_ready((outs, hT, cT))

    hid_r = hidden
    outs_ref = []
    for t in range(T):
        o_r, hid_r = _ref_forward(xs[t], hid_r, raw_params)
        outs_ref.append(o_r)
    outs_ref = jnp.concatenate(outs_ref, axis=0)
    assert outs.shape == (T, output_size)
    assert jnp.allclose(outs, outs_ref, atol=2e-3), float(jnp.abs(outs - outs_ref).max())
    assert jnp.allclose(hT, hid_r[0], atol=2e-3)
    assert jnp.allclose(cT, hid_r[1], atol=2e-3)

    print("KERNEL_OK")
</pallas_src>

<mosaic_0001>
module attributes {stable_mosaic.version = 11 : i64} {
  func.func @_lstm_seq_decode_kernel(%arg0: i32, %arg1: memref<1x128xf32, #tpu.memory_space<vmem>>, %arg2: memref<1x128xf32, #tpu.memory_space<vmem>>, %arg3: memref<1x128xf32, #tpu.memory_space<vmem>>, %arg4: memref<128x512xf32, #tpu.memory_space<vmem>>, %arg5: memref<128x512xf32, #tpu.memory_space<vmem>>, %arg6: memref<1x512xf32, #tpu.memory_space<vmem>>, %arg7: memref<128x128xf32, #tpu.memory_space<vmem>>, %arg8: memref<1x128xf32, #tpu.memory_space<vmem>>, %arg9: memref<1x128xf32, #tpu.memory_space<vmem>>, %arg10: memref<1x128xf32, #tpu.memory_space<vmem>>, %arg11: memref<1x128xf32, #tpu.memory_space<vmem>>, %arg12: memref<1x512xf32, #tpu.memory_space<vmem>>, %arg13: memref<1x128xf32, #tpu.memory_space<vmem>>) attributes {dimension_semantics = [#tpu.dimension_semantics<arbitrary>], iteration_bounds = array<i64: 1>, scalar_prefetch = 0 : i64, scratch_operands = 2 : i64, tpu.core_type = #tpu.core_type<tc>, window_params = [{pipeline_mode = #tpu.pipeline_mode<synchronous>, transform_indices = @transform_0, window_bounds = array<i64: 1, 128>}, {pipeline_mode = #tpu.pipeline_mode<synchronous>, transform_indices = @transform_1, window_bounds = array<i64: 1, 128>}, {pipeline_mode = #tpu.pipeline_mode<synchronous>, transform_indices = @transform_2, window_bounds = array<i64: 1, 128>}, {pipeline_mode = #tpu.pipeline_mode<synchronous>, transform_indices = @transform_3, window_bounds = array<i64: 128, 512>}, {pipeline_mode = #tpu.pipeline_mode<synchronous>, transform_indices = @transform_4, window_bounds = array<i64: 128, 512>}, {pipeline_mode = #tpu.pipeline_mode<synchronous>, transform_indices = @transform_5, window_bounds = array<i64: 1, 512>}, {pipeline_mode = #tpu.pipeline_mode<synchronous>, transform_indices = @transform_6, window_bounds = array<i64: 128, 128>}, {pipeline_mode = #tpu.pipeline_mode<synchronous>, transform_indices = @transform_7, window_bounds = array<i64: 1, 128>}, {pipeline_mode = #tpu.pipeline_mode<synchronous>, transform_indices = @transform_8, window_bounds = array<i64: 1, 128>}, {pipeline_mode = #tpu.pipeline_mode<synchronous>, transform_indices = @transform_9, window_bounds = array<i64: 1, 128>}, {pipeline_mode = #tpu.pipeline_mode<synchronous>, transform_indices = @transform_10, window_bounds = array<i64: 1, 128>}]} {
    %c0 = arith.constant 0 : index
    %c0_0 = arith.constant 0 : index
    %0 = vector.load %arg1[%c0, %c0_0] : memref<1x128xf32, #tpu.memory_space<vmem>>, vector<1x128xf32>
    %c0_1 = arith.constant 0 : index
    %c0_2 = arith.constant 0 : index
    %1 = vector.load %arg4[%c0_1, %c0_2] : memref<128x512xf32, #tpu.memory_space<vmem>>, vector<128x512xf32>
    %cst = arith.constant dense<0.000000e+00> : vector<1x512xf32>
    %2 = tpu.matmul %0, %1, %cst {dimension_numbers = #tpu.dot_dimension_numbers<[1], [0], [0], [1], [0, 0, 1, 1], [], []>} : vector<1x128xf32>, vector<128x512xf32>, vector<1x512xf32> -> vector<1x512xf32>
    %c0_3 = arith.constant 0 : index
    %c0_4 = arith.constant 0 : index
    %3 = vector.load %arg6[%c0_3, %c0_4] : memref<1x512xf32, #tpu.memory_space<vmem>>, vector<1x512xf32>
    %4 = arith.addf %2, %3 : vector<1x512xf32>
    %c0_5 = arith.constant 0 : index
    %c0_6 = arith.constant 0 : index
    %5 = vector.load %arg12[%c0_5, %c0_6] : memref<1x512xf32, #tpu.memory_space<vmem>>, vector<1x512xf32>
    tpu.vector_store %arg12[%c0_5, %c0_6], %4 {strides = array<i32>} : memref<1x512xf32, #tpu.memory_space<vmem>>, vector<1x512xf32>,
    %c0_7 = arith.constant 0 : index
    %c0_8 = arith.constant 0 : index
    %6 = vector.load %arg2[%c0_7, %c0_8] : memref<1x128xf32, #tpu.memory_space<vmem>>, vector<1x128xf32>
    %c0_9 = arith.constant 0 : index
    %c0_10 = arith.constant 0 : index
    %7 = vector.load %arg3[%c0_9, %c0_10] : memref<1x128xf32, #tpu.memory_space<vmem>>, vector<1x128xf32>
    %c0_i32 = arith.constant 0 : i32
    %8 = arith.index_cast %c0_i32 : i32 to index
    %c0_11 = arith.constant 0 : index
    %9 = vector.load %arg12[%8, %c0_11] : memref<1x512xf32, #tpu.memory_space<vmem>>, vector<1x512xf32>
    %c0_12 = arith.constant 0 : index
    %c0_13 = arith.constant 0 : index
    %10 = vector.load %arg5[%c0_12, %c0_13] : memref<128x512xf32, #tpu.memory_space<vmem>>, vector<128x512xf32>
    %cst_14 = arith.constant dense<0.000000e+00> : vector<1x512xf32>
    %11 = tpu.matmul %6, %10, %cst_14 {dimension_numbers = #tpu.dot_dimension_numbers<[1], [0], [0], [1], [0, 0, 1, 1], [], []>} : vector<1x128xf32>, vector<128x512xf32>, vector<1x512xf32> -> vector<1x512xf32>
    %12 = arith.addf %9, %11 : vector<1x512xf32>
    %13 = vector.extract_strided_slice %12 {offsets = [0, 0], sizes = [1, 128], strides = [1, 1]} : vector<1x512xf32> to vector<1x128xf32>
    %14 = arith.negf %13 : vector<1x128xf32>
    %15 = math.exp %14 : vector<1x128xf32>
    %cst_15 = arith.constant 1.000000e+00 : f32
    %16 = vector.broadcast %cst_15 : f32 to vector<1x128xf32>
    %17 = arith.addf %16, %15 : vector<1x128xf32>
    %18 = arith.divf %16, %17 : vector<1x128xf32>
    %19 = vector.extract_strided_slice %12 {offsets = [0, 128], sizes = [1, 128], strides = [1, 1]} : vector<1x512xf32> to vector<1x128xf32>
    %20 = arith.negf %19 : vector<1x128xf32>
    %21 = math.exp %20 : vector<1x128xf32>
    %cst_16 = arith.constant 1.000000e+00 : f32
    %22 = vector.broadcast %cst_16 : f32 to vector<1x128xf32>
    %23 = arith.addf %22, %21 : vector<1x128xf32>
    %24 = arith.divf %22, %23 : vector<1x128xf32>
    %25 = vector.extract_strided_slice %12 {offsets = [0, 256], sizes = [1, 128], strides = [1, 1]} : vector<1x512xf32> to vector<1x128xf32>
    %26 = math.tanh %25 : vector<1x128xf32>
    %27 = vector.extract_strided_slice %12 {offsets = [0, 384], sizes = [1, 128], strides = [1, 1]} : vector<1x512xf32> to vector<1x128xf32>
    %28 = arith.negf %27 : vector<1x128xf32>
    %29 = math.exp %28 : vector<1x128xf32>
    %cst_17 = arith.constant 1.000000e+00 : f32
    %30 = vector.broadcast %cst_17 : f32 to vector<1x128xf32>
    %31 = arith.addf %30, %29 : vector<1x128xf32>
    %32 = arith.divf %30, %31 : vector<1x128xf32>
    %33 = arith.mulf %24, %7 : vector<1x128xf32>
    %34 = arith.mulf %18, %26 : vector<1x128xf32>
    %35 = arith.addf %33, %34 : vector<1x128xf32>
    %36 = math.tanh %35 : vector<1x128xf32>
    %37 = arith.mulf %32, %36 : vector<1x128xf32>
    %38 = arith.index_cast %c0_i32 : i32 to index
    %c0_18 = arith.constant 0 : index
    %39 = vector.load %arg13[%38, %c0_18] : memref<1x128xf32, #tpu.memory_space<vmem>>, vector<1x128xf32>
    tpu.vector_store %arg13[%38, %c0_18], %37 {strides = array<i32>} : memref<1x128xf32, #tpu.memory_space<vmem>>, vector<1x128xf32>,
    %c1_i32 = arith.constant 1 : i32
    %c0_19 = arith.constant 0 : index
    %c0_20 = arith.constant 0 : index
    %40 = vector.load %arg10[%c0_19, %c0_20] : memref<1x128xf32, #tpu.memory_space<vmem>>, vector<1x128xf32>
    tpu.vector_store %arg10[%c0_19, %c0_20], %37 {strides = array<i32>} : memref<1x128xf32, #tpu.memory_space<vmem>>, vector<1x128xf32>,
    %c0_21 = arith.constant 0 : index
    %c0_22 = arith.constant 0 : index
    %41 = vector.load %arg11[%c0_21, %c0_22] : memref<1x128xf32, #tpu.memory_space<vmem>>, vector<1x128xf32>
    tpu.vector_store %arg11[%c0_21, %c0_22], %35 {strides = array<i32>} : memref<1x128xf32, #tpu.memory_space<vmem>>, vector<1x128xf32>,
    %c0_23 = arith.constant 0 : index
    %c0_24 = arith.constant 0 : index
    %42 = vector.load %arg13[%c0_23, %c0_24] : memref<1x128xf32, #tpu.memory_space<vmem>>, vector<1x128xf32>
    %c0_25 = arith.constant 0 : index
    %c0_26 = arith.constant 0 : index
    %43 = vector.load %arg7[%c0_25, %c0_26] : memref<128x128xf32, #tpu.memory_space<vmem>>, vector<128x128xf32>
    %cst_27 = arith.constant dense<0.000000e+00> : vector<1x128xf32>
    %44 = tpu.matmul %42, %43, %cst_27 {dimension_numbers = #tpu.dot_dimension_numbers<[1], [0], [0], [1], [0, 0, 1, 1], [], []>} : vector<1x128xf32>, vector<128x128xf32>, vector<1x128xf32> -> vector<1x128xf32>
    %c0_28 = arith.constant 0 : index
    %c0_29 = arith.constant 0 : index
    %45 = vector.load %arg8[%c0_28, %c0_29] : memref<1x128xf32, #tpu.memory_space<vmem>>, vector<1x128xf32>
    %46 = arith.addf %44, %45 : vector<1x128xf32>
    %c0_30 = arith.constant 0 : index
    %c0_31 = arith.constant 0 : index
    %47 = vector.load %arg9[%c0_30, %c0_31] : memref<1x128xf32, #tpu.memory_space<vmem>>, vector<1x128xf32>
    tpu.vector_store %arg9[%c0_30, %c0_31], %46 {strides = array<i32>} : memref<1x128xf32, #tpu.memory_space<vmem>>, vector<1x128xf32>,
    return
  }
  func.func @transform_0(%arg0: i32) -> (i32, i32) {
    %c0_i32 = arith.constant 0 : i32
    %c0_i32_0 = arith.constant 0 : i32
    %c0_i32_1 = arith.constant 0 : i32
    return %c0_i32, %c0_i32_0 : i32, i32
  }
  func.func @transform_1(%arg0: i32) -> (i32, i32) {
    %c0_i32 = arith.constant 0 : i32
    %c0_i32_0 = arith.constant 0 : i32
    %c0_i32_1 = arith.constant 0 : i32
    return %c0_i32, %c0_i32_0 : i32, i32
  }
  func.func @transform_2(%arg0: i32) -> (i32, i32) {
    %c0_i32 = arith.constant 0 : i32
    %c0_i32_0 = arith.constant 0 : i32
    %c0_i32_1 = arith.constant 0 : i32
    return %c0_i32, %c0_i32_0 : i32, i32
  }
  func.func @transform_3(%arg0: i32) -> (i32, i32) {
    %c0_i32 = arith.constant 0 : i32
    %c0_i32_0 = arith.constant 0 : i32
    %c0_i32_1 = arith.constant 0 : i32
    return %c0_i32, %c0_i32_0 : i32, i32
  }
  func.func @transform_4(%arg0: i32) -> (i32, i32) {
    %c0_i32 = arith.constant 0 : i32
    %c0_i32_0 = arith.constant 0 : i32
    %c0_i32_1 = arith.constant 0 : i32
    return %c0_i32, %c0_i32_0 : i32, i32
  }
  func.func @transform_5(%arg0: i32) -> (i32, i32) {
    %c0_i32 = arith.constant 0 : i32
    %c0_i32_0 = arith.constant 0 : i32
    %c0_i32_1 = arith.constant 0 : i32
    return %c0_i32, %c0_i32_0 : i32, i32
  }
  func.func @transform_6(%arg0: i32) -> (i32, i32) {
    %c0_i32 = arith.constant 0 : i32
    %c0_i32_0 = arith.constant 0 : i32
    %c0_i32_1 = arith.constant 0 : i32
    return %c0_i32, %c0_i32_0 : i32, i32
  }
  func.func @transform_7(%arg0: i32) -> (i32, i32) {
    %c0_i32 = arith.constant 0 : i32
    %c0_i32_0 = arith.constant 0 : i32
    %c0_i32_1 = arith.constant 0 : i32
    return %c0_i32, %c0_i32_0 : i32, i32
  }
  func.func @transform_8(%arg0: i32) -> (i32, i32) {
    %c0_i32 = arith.constant 0 : i32
    %c0_i32_0 = arith.constant 0 : i32
    %c0_i32_1 = arith.constant 0 : i32
    return %c0_i32, %c0_i32_0 : i32, i32
  }
  func.func @transform_9(%arg0: i32) -> (i32, i32) {
    %c0_i32 = arith.constant 0 : i32
    %c0_i32_0 = arith.constant 0 : i32
    %c0_i32_1 = arith.constant 0 : i32
    return %c0_i32, %c0_i32_0 : i32, i32
  }
  func.func @transform_10(%arg0: i32) -> (i32, i32) {
    %c0_i32 = arith.constant 0 : i32
    %c0_i32_0 = arith.constant 0 : i32
    %c0_i32_1 = arith.constant 0 : i32
    return %c0_i32, %c0_i32_0 : i32, i32
  }
}

</mosaic_0001>

<bundles_post_ra>
// kernel: rnn_forward_seq.1
= control target key start
LH: loop header
LB: loop body
LE: loop exit
PB: predicated region body
PF: predicated region fallthrough
CT: control target
= control target key end

     0   :  { %16 = vsyncpa [#allocation5], 0  ;;  %s782_s0 = inlined_call_operand.vmem [shape: f32[1,128], index: 0, kind: input, shape index: {}]   ;;  %s783_s1 = inlined_call_operand.vmem [shape: f32[1,128], index: 1, kind: input, shape index: {}, may-alias: {1,9}]   ;;  %s784_s2 = inlined_call_operand.vmem [shape: f32[1,128], index: 2, kind: input, shape index: {}, may-alias: {2,10}]   ;;  %s785_s3 = inlined_call_operand.hbm [shape: f32[128,512], index: 3, kind: input, shape index: {}]   ;;  %s786_s4 = inlined_call_operand.hbm [shape: f32[128,512], index: 4, kind: input, shape index: {}]   ;;  %s787_s5 = inlined_call_operand.vmem [shape: f32[1,512], index: 5, kind: input, shape index: {}]   ;;  %s788_s6 = inlined_call_operand.hbm [shape: f32[128,128], index: 6, kind: input, shape index: {}]   ;;  %s789_s7 = inlined_call_operand.vmem [shape: f32[1,128], index: 7, kind: input, shape index: {}]   ;;  %s790_s8 = inlined_call_operand.hbm [shape: f32[1,128], index: 8, kind: output, shape index: {0}]   ;;  %s791_s9 = inlined_call_operand.vmem [shape: f32[1,128], index: 9, kind: output, shape index: {1}, may-alias: {1,9}]   ;;  %s792_s10 = inlined_call_operand.vmem [shape: f32[1,128], index: 10, kind: output, shape index: {2}, may-alias: {2,10}]  }
   0x1   :  { %17 = vsyncpa [#allocation8], 0 }
   0x2   :  { %18 = vsyncpa [#allocation6], 0  ;;  %s42_s15 = sshll.u32 %s786_s4, 4  ;;  %s680_s16 = smov [#allocation7]   ;;  %s43_s15 = int_to_ptr.hbm [resolvable:$true] %s42_s15 }
   0x3   :  { %s44_s17 = sshll.u32 %s680_s16, 4  ;;  %s29_s20 = sshll.u32 %s785_s3, 4  ;;  %s45_s17 = int_to_ptr.vmem [resolvable:$true] %s44_s17  ;;  %s30_s20 = int_to_ptr.hbm [resolvable:$true] %s29_s20 }
   0x4   :  { %s681_s21 = smov 512   ;;  %s682_s22 = smov 32  }
   0x5   :  { %50 = dma.hbm_to_vmem [thread:$0]  %s43_s15, 8192, %s45_s17, [#allocation8], %s681_s21, %s681_s21, %s682_s22  }
   0x6   :  { %s683_s23 = smov [#allocation4]   ;;  %s57_s27 = sshll.u32 %s788_s6, 4  ;;  %s58_s27 = int_to_ptr.hbm [resolvable:$true] %s57_s27 }
   0x7   :  { %s31_s24 = sshll.u32 %s683_s23, 4  ;;  %s684_s4 = smov [#allocation9]   ;;  %s32_s24 = int_to_ptr.vmem [resolvable:$true] %s31_s24 }
   0x8   :  { %37 = dma.hbm_to_vmem [thread:$0]  %s30_s20, 8192, %s32_s24, [#allocation5], %s681_s21, %s681_s21, %s682_s22  }
   0x9   :  { %s59_s28 = sshll.u32 %s684_s4, 4  ;;  %s685_s29 = smov 128   ;;  %s60_s28 = int_to_ptr.vmem [resolvable:$true] %s59_s28 }
   0xa   :  { %s686_s30 = smov 8  }
   0xb   :  { %65 = dma.hbm_to_vmem [thread:$0]  %s58_s27, 2048, %s60_s28, [#allocation8], %s685_s29, %s685_s29, %s686_s30  }
   0xc   :  { %674 = dma.done.wait [#allocation5], 8192  }
   0xd   :  { %675 = vsyncadd [#allocation5], 4294959104 }
   0xe   :  { %676 = dma.done.wait [#allocation8], 10240  }
   0xf   :  { %677 = vsyncadd [#allocation8], 4294957056  ;;  %v143_v0 = vld [vmem:[#allocation4 + $0x1f0] sm:$0xff]  ;;  %v144_v1 = vld [vmem:[#allocation4 + $0x1f8] sm:$0xff]  ;;  %vm244_vm0 = vcmask 1042434   ;;  %vm242_vm1 = vcmask 1040384  }
  0x10   :  { %v139_v2 = vld [vmem:[#allocation4 + $0x1d0] sm:$0xff]  ;;  %195 = vmatpush.msra.mxu2 %v143_v0  ;;  %215 = vmatpush.msra.mxu3 %v144_v1  ;;  %v140_v3 = vld [vmem:[#allocation4 + $0x1d8] sm:$0xff]  ;;  %v142_v6 = vld [vmem:[#allocation4 + $0x1e8] sm:$0xff]  ;;  %vm246_vm2 = vcmask 1041408   ;;  %s532_s22 = sshll.u32 %s790_s8, 4  ;;  %s533_s22 = int_to_ptr.hbm [resolvable:$true] %s532_s22 }
  0x11   :  { %v135_v4 = vld [vmem:[#allocation4 + $0x1b0] sm:$0xff]  ;;  %v136_v5 = vld [vmem:[#allocation4 + $0x1b8] sm:$0xff]  ;;  %v141_v7 = vld [vmem:[#allocation4 + $0x1e0] sm:$0xff]  ;;  %175 = vmatpush.msra.mxu1 %v142_v6 }
  0x12   :  { %196 = vmatpush.msra.mxu2 %v139_v2  ;;  %216 = vmatpush.msra.mxu3 %v140_v3  ;;  %v138_v8 = vld [vmem:[#allocation4 + $0x1c8] sm:$0xff]  ;;  %v131_v9 = vld [vmem:[#allocation4 + $0x190] sm:$0xff]  ;;  %v132_v10 = vld [vmem:[#allocation4 + $0x198] sm:$0xff] }
  0x13   :  { %155 = vmatpush.msra.mxu0 %v141_v7  ;;  %v137_v11 = vld [vmem:[#allocation4 + $0x1c0] sm:$0xff]  ;;  %v134_v12 = vld [vmem:[#allocation4 + $0x1a8] sm:$0xff]  ;;  %176 = vmatpush.msra.mxu1 %v138_v8  ;;  %v127_v14 = vld [vmem:[#allocation4 + $0x170] sm:$0xff] }
  0x14   :  { %197 = vmatpush.msra.mxu2 %v135_v4  ;;  %217 = vmatpush.msra.mxu3 %v136_v5  ;;  %v133_v13 = vld [vmem:[#allocation4 + $0x1a0] sm:$0xff]  ;;  %v128_v15 = vld [vmem:[#allocation4 + $0x178] sm:$0xff]  ;;  %v130_v16 = vld [vmem:[#allocation4 + $0x188] sm:$0xff] }
  0x15   :  { %156 = vmatpush.msra.mxu0 %v137_v11  ;;  %v129_v17 = vld [vmem:[#allocation4 + $0x180] sm:$0xff]  ;;  %177 = vmatpush.msra.mxu1 %v134_v12  ;;  %v123_v18 = vld [vmem:[#allocation4 + $0x150] sm:$0xff]  ;;  %v124_v19 = vld [vmem:[#allocation4 + $0x158] sm:$0xff] }
  0x16   :  { %198 = vmatpush.msra.mxu2 %v131_v9  ;;  %218 = vmatpush.msra.mxu3 %v132_v10  ;;  %v126_v20 = vld [vmem:[#allocation4 + $0x168] sm:$0xff]  ;;  %v125_v21 = vld [vmem:[#allocation4 + $0x160] sm:$0xff]  ;;  %v119_v22 = vld [vmem:[#allocation4 + $0x130] sm:$0xff] }
  0x17   :  { %157 = vmatpush.msra.mxu0 %v133_v13  ;;  %178 = vmatpush.msra.mxu1 %v130_v16  ;;  %v120_v23 = vld [vmem:[#allocation4 + $0x138] sm:$0xff]  ;;  %v122_v24 = vld [vmem:[#allocation4 + $0x148] sm:$0xff]  ;;  %v121_v25 = vld [vmem:[#allocation4 + $0x140] sm:$0xff] }
  0x18   :  { %199 = vmatpush.msra.mxu2 %v127_v14  ;;  %219 = vmatpush.msra.mxu3 %v128_v15  ;;  %v115_v26 = vld [vmem:[#allocation4 + $0x110] sm:$0xff]  ;;  %v116_v27 = vld [vmem:[#allocation4 + $0x118] sm:$0xff]  ;;  %v118_v28 = vld [vmem:[#allocation4 + $0x128] sm:$0xff] }
  0x19   :  { %158 = vmatpush.msra.mxu0 %v129_v17  ;;  %179 = vmatpush.msra.mxu1 %v126_v20  ;;  %v117_v29 = vld [vmem:[#allocation4 + $0x120] sm:$0xff]  ;;  %v111_v30 = vld [vmem:[#allocation4 + $0xf0] sm:$0xff]  ;;  %v112_v31 = vld [vmem:[#allocation4 + $0xf8] sm:$0xff] }
  0x1a   :  { %200 = vmatpush.msra.mxu2 %v123_v18  ;;  %220 = vmatpush.msra.mxu3 %v124_v19  ;;  %v114_v32 = vld [vmem:[#allocation4 + $0x108] sm:$0xff]  ;;  %v113_v33 = vld [vmem:[#allocation4 + $0x100] sm:$0xff]  ;;  %v107_v34 = vld [vmem:[#allocation4 + $0xd0] sm:$0xff] }
  0x1b   :  { %159 = vmatpush.msra.mxu0 %v125_v21  ;;  %180 = vmatpush.msra.mxu1 %v122_v24  ;;  %v108_v35 = vld [vmem:[#allocation4 + $0xd8] sm:$0xff]  ;;  %v110_v36 = vld [vmem:[#allocation4 + $0xe8] sm:$0xff]  ;;  %v109_v37 = vld [vmem:[#allocation4 + $0xe0] sm:$0xff] }
  0x1c   :  { %201 = vmatpush.msra.mxu2 %v119_v22  ;;  %221 = vmatpush.msra.mxu3 %v120_v23  ;;  %v103_v38 = vld [vmem:[#allocation4 + $0xb0] sm:$0xff]  ;;  %v104_v39 = vld [vmem:[#allocation4 + $0xb8] sm:$0xff]  ;;  %v106_v40 = vld [vmem:[#allocation4 + $0xc8] sm:$0xff] }
  0x1d   :  { %160 = vmatpush.msra.mxu0 %v121_v25  ;;  %181 = vmatpush.msra.mxu1 %v118_v28  ;;  %v105_v41 = vld [vmem:[#allocation4 + $0xc0] sm:$0xff]  ;;  %v99_v42 = vld [vmem:[#allocation4 + $0x90] sm:$0xff]  ;;  %v100_v43 = vld [vmem:[#allocation4 + $0x98] sm:$0xff] }
  0x1e   :  { %202 = vmatpush.msra.mxu2 %v115_v26  ;;  %222 = vmatpush.msra.mxu3 %v116_v27  ;;  %v102_v44 = vld [vmem:[#allocation4 + $0xa8] sm:$0xff]  ;;  %v101_v45 = vld [vmem:[#allocation4 + $0xa0] sm:$0xff]  ;;  %v95_v46 = vld [vmem:[#allocation4 + $0x70] sm:$0xff] }
  0x1f   :  { %161 = vmatpush.msra.mxu0 %v117_v29  ;;  %182 = vmatpush.msra.mxu1 %v114_v32  ;;  %v96_v47 = vld [vmem:[#allocation4 + $0x78] sm:$0xff]  ;;  %v98_v48 = vld [vmem:[#allocation4 + $0x88] sm:$0xff]  ;;  %v97_v49 = vld [vmem:[#allocation4 + $0x80] sm:$0xff] }
  0x20   :  { %203 = vmatpush.msra.mxu2 %v111_v30  ;;  %223 = vmatpush.msra.mxu3 %v112_v31  ;;  %v91_v50 = vld [vmem:[#allocation4 + $0x50] sm:$0xff]  ;;  %v92_v51 = vld [vmem:[#allocation4 + $0x58] sm:$0xff]  ;;  %v94_v52 = vld [vmem:[#allocation4 + $0x68] sm:$0xff] }
  0x21   :  { %162 = vmatpush.msra.mxu0 %v113_v33  ;;  %183 = vmatpush.msra.mxu1 %v110_v36  ;;  %v93_v53 = vld [vmem:[#allocation4 + $0x60] sm:$0xff]  ;;  %v87_v54 = vld [vmem:[#allocation4 + $0x30] sm:$0xff]  ;;  %v88_v55 = vld [vmem:[#allocation4 + $0x38] sm:$0xff] }
  0x22   :  { %204 = vmatpush.msra.mxu2 %v107_v34  ;;  %224 = vmatpush.msra.mxu3 %v108_v35  ;;  %v90_v56 = vld [vmem:[#allocation4 + $0x48] sm:$0xff]  ;;  %v89_v57 = vld [vmem:[#allocation4 + $0x40] sm:$0xff]  ;;  %v83_v58 = vld [vmem:[#allocation4 + $0x10] sm:$0xff] }
  0x23   :  { %163 = vmatpush.msra.mxu0 %v109_v37  ;;  %184 = vmatpush.msra.mxu1 %v106_v40  ;;  %v84_v59 = vld [vmem:[#allocation4 + $0x18] sm:$0xff]  ;;  %v319_v60 = vld [vmem:[#allocation7 + $0x1f0] sm:$0xff]  ;;  %v86_v62 = vld [vmem:[#allocation4 + $0x28] sm:$0xff] }
  0x24   :  { %205 = vmatpush.msra.mxu2 %v103_v38  ;;  %225 = vmatpush.msra.mxu3 %v104_v39  ;;  %v320_v61 = vld [vmem:[#allocation7 + $0x1f8] sm:$0xff]  ;;  %v85_v63 = vld [vmem:[#allocation4 + $0x20] sm:$0xff]  ;;  %v315_v0 = vld [vmem:[#allocation7 + $0x1d0] sm:$0xff] }
  0x25   :  { %164 = vmatpush.msra.mxu0 %v105_v41  ;;  %185 = vmatpush.msra.mxu1 %v102_v44  ;;  %v316_v1 = vld [vmem:[#allocation7 + $0x1d8] sm:$0xff]  ;;  %v82_v2 = vld [vmem:[#allocation4 + $0x8] sm:$0xff]  ;;  %v81_v3 = vld [vmem:[#allocation4] sm:$0xff] }
  0x26   :  { %206 = vmatpush.msra.mxu2 %v99_v42  ;;  %226 = vmatpush.msra.mxu3 %v100_v43  ;;  %v311_v4 = vld [vmem:[#allocation7 + $0x1b0] sm:$0xff]  ;;  %v312_v5 = vld [vmem:[#allocation7 + $0x1b8] sm:$0xff]  ;;  %v318_v6 = vld [vmem:[#allocation7 + $0x1e8] sm:$0xff] }
  0x27   :  { %165 = vmatpush.msra.mxu0 %v101_v45  ;;  %186 = vmatpush.msra.mxu1 %v98_v48  ;;  %v317_v7 = vld [vmem:[#allocation7 + $0x1e0] sm:$0xff]  ;;  %v307_v8 = vld [vmem:[#allocation7 + $0x190] sm:$0xff]  ;;  %v308_v9 = vld [vmem:[#allocation7 + $0x198] sm:$0xff] }
  0x28   :  { %207 = vmatpush.msra.mxu2 %v95_v46  ;;  %227 = vmatpush.msra.mxu3 %v96_v47  ;;  %v314_v10 = vld [vmem:[#allocation7 + $0x1c8] sm:$0xff]  ;;  %v313_v11 = vld [vmem:[#allocation7 + $0x1c0] sm:$0xff]  ;;  %v303_v12 = vld [vmem:[#allocation7 + $0x170] sm:$0xff] }
  0x29   :  { %166 = vmatpush.msra.mxu0 %v97_v49  ;;  %187 = vmatpush.msra.mxu1 %v94_v52  ;;  %v304_v13 = vld [vmem:[#allocation7 + $0x178] sm:$0xff]  ;;  %v310_v14 = vld [vmem:[#allocation7 + $0x1a8] sm:$0xff]  ;;  %v309_v15 = vld [vmem:[#allocation7 + $0x1a0] sm:$0xff] }
  0x2a   :  { %208 = vmatpush.msra.mxu2 %v91_v50  ;;  %228 = vmatpush.msra.mxu3 %v92_v51  ;;  %v299_v16 = vld [vmem:[#allocation7 + $0x150] sm:$0xff]  ;;  %v300_v17 = vld [vmem:[#allocation7 + $0x158] sm:$0xff]  ;;  %v306_v18 = vld [vmem:[#allocation7 + $0x188] sm:$0xff] }
  0x2b   :  { %167 = vmatpush.msra.mxu0 %v93_v53  ;;  %188 = vmatpush.msra.mxu1 %v90_v56  ;;  %v305_v19 = vld [vmem:[#allocation7 + $0x180] sm:$0xff]  ;;  %v295_v20 = vld [vmem:[#allocation7 + $0x130] sm:$0xff]  ;;  %v296_v21 = vld [vmem:[#allocation7 + $0x138] sm:$0xff] }
  0x2c   :  { %209 = vmatpush.msra.mxu2 %v87_v54  ;;  %229 = vmatpush.msra.mxu3 %v88_v55  ;;  %v302_v22 = vld [vmem:[#allocation7 + $0x168] sm:$0xff]  ;;  %v301_v23 = vld [vmem:[#allocation7 + $0x160] sm:$0xff]  ;;  %v291_v24 = vld [vmem:[#allocation7 + $0x110] sm:$0xff] }
  0x2d   :  { %168 = vmatpush.msra.mxu0 %v89_v57  ;;  %189 = vmatpush.msra.mxu1 %v86_v62  ;;  %v292_v25 = vld [vmem:[#allocation7 + $0x118] sm:$0xff]  ;;  %v298_v26 = vld [vmem:[#allocation7 + $0x148] sm:$0xff]  ;;  %v297_v27 = vld [vmem:[#allocation7 + $0x140] sm:$0xff] }
  0x2e   :  { %210 = vmatpush.msra.mxu2 %v83_v58  ;;  %230 = vmatpush.msra.mxu3 %v84_v59  ;;  %v287_v28 = vld [vmem:[#allocation7 + $0xf0] sm:$0xff]  ;;  %v288_v29 = vld [vmem:[#allocation7 + $0xf8] sm:$0xff]  ;;  %v294_v30 = vld [vmem:[#allocation7 + $0x128] sm:$0xff] }
  0x2f   :  { %169 = vmatpush.msra.mxu0 %v85_v63  ;;  %190 = vmatpush.msra.mxu1 %v82_v2  ;;  %v293_v31 = vld [vmem:[#allocation7 + $0x120] sm:$0xff]  ;;  %v283_v32 = vld [vmem:[#allocation7 + $0xd0] sm:$0xff]  ;;  %v284_v33 = vld [vmem:[#allocation7 + $0xd8] sm:$0xff] }
  0x30   :  { %361 = vmatpush.msrb.mxu2 %v319_v60  ;;  %381 = vmatpush.msrb.mxu3 %v320_v61  ;;  %v290_v34 = vld [vmem:[#allocation7 + $0x108] sm:$0xff]  ;;  %v80_v35 = vld [vmem:[%s782_s0] sm:$0x1]  ;;  %v279_v36 = vld [vmem:[#allocation7 + $0xb0] sm:$0xff] }
  0x31   :  { %170 = vmatpush.msra.mxu0 %v81_v3  ;;  %341 = vmatpush.msrb.mxu1 %v318_v6  ;;  %v280_v37 = vld [vmem:[#allocation7 + $0xb8] sm:$0xff]  ;;  %v289_v38 = vld [vmem:[#allocation7 + $0x100] sm:$0xff]  ;;  %v286_v39 = vld [vmem:[#allocation7 + $0xe8] sm:$0xff] }
  0x32   :  { %362 = vmatpush.msrb.mxu2 %v315_v0  ;;  %382 = vmatpush.msrb.mxu3 %v316_v1  ;;  %v275_v40 = vld [vmem:[#allocation7 + $0x90] sm:$0xff]  ;;  %v276_v41 = vld [vmem:[#allocation7 + $0x98] sm:$0xff]  ;;  %v285_v42 = vld [vmem:[#allocation7 + $0xe0] sm:$0xff] }
  0x33   :  { %321 = vmatpush.msrb.mxu0 %v317_v7  ;;  %342 = vmatpush.msrb.mxu1 %v314_v10  ;;  %v282_v43 = vld [vmem:[#allocation7 + $0xc8] sm:$0xff]  ;;  %v271_v44 = vld [vmem:[#allocation7 + $0x70] sm:$0xff]  ;;  %v272_v45 = vld [vmem:[#allocation7 + $0x78] sm:$0xff] }
  0x34   :  { %363 = vmatpush.msrb.mxu2 %v311_v4  ;;  %383 = vmatpush.msrb.mxu3 %v312_v5  ;;  %v281_v46 = vld [vmem:[#allocation7 + $0xc0] sm:$0xff]  ;;  %v278_v47 = vld [vmem:[#allocation7 + $0xa8] sm:$0xff]  ;;  %v267_v48 = vld [vmem:[#allocation7 + $0x50] sm:$0xff] }
  0x35   :  { %322 = vmatpush.msrb.mxu0 %v313_v11  ;;  %343 = vmatpush.msrb.mxu1 %v310_v14  ;;  %v268_v49 = vld [vmem:[#allocation7 + $0x58] sm:$0xff]  ;;  %v277_v50 = vld [vmem:[#allocation7 + $0xa0] sm:$0xff]  ;;  %v274_v51 = vld [vmem:[#allocation7 + $0x88] sm:$0xff]  ;;  %v249_v14 = vlaneseq }
  0x36   :  { %364 = vmatpush.msrb.mxu2 %v307_v8  ;;  %384 = vmatpush.msrb.mxu3 %v308_v9  ;;  %v263_v52 = vld [vmem:[#allocation7 + $0x30] sm:$0xff]  ;;  %v264_v53 = vld [vmem:[#allocation7 + $0x38] sm:$0xff]  ;;  %v270_v54 = vld [vmem:[#allocation7 + $0x68] sm:$0xff] }
  0x37   :  { %323 = vmatpush.msrb.mxu0 %v309_v15  ;;  %344 = vmatpush.msrb.mxu1 %v306_v18  ;;  %v273_v55 = vld [vmem:[#allocation7 + $0x80] sm:$0xff]  ;;  %v259_v56 = vld [vmem:[#allocation7 + $0x10] sm:$0xff]  ;;  %v260_v57 = vld [vmem:[#allocation7 + $0x18] sm:$0xff]  ;;  %vm251_vm3 = vcmp.lt.s32.totalorder %v249_v14, 512 }
  0x38   :  { %365 = vmatpush.msrb.mxu2 %v303_v12  ;;  %385 = vmatpush.msrb.mxu3 %v304_v13  ;;  %v254_v58 = vld [vmem:[%s783_s1] sm:$0x1]  ;;  %v269_v59 = vld [vmem:[#allocation7 + $0x60] sm:$0xff]  ;;  %v266_v60 = vld [vmem:[#allocation7 + $0x48] sm:$0xff] }
  0x39   :  { %324 = vmatpush.msrb.mxu0 %v305_v19  ;;  %345 = vmatpush.msrb.mxu1 %v302_v22  ;;  %v265_v61 = vld [vmem:[#allocation7 + $0x40] sm:$0xff]  ;;  %v262_v62 = vld [vmem:[#allocation7 + $0x28] sm:$0xff]  ;;  %v145_v2 = vld [vmem:[%s787_s5] sm:$0xf] }
  0x3a   :  { %366 = vmatpush.msrb.mxu2 %v299_v16  ;;  %386 = vmatpush.msrb.mxu3 %v300_v17  ;;  %v261_v63 = vld [vmem:[#allocation7 + $0x20] sm:$0xff]  ;;  %v258_v0 = vld [vmem:[#allocation7 + $0x8] sm:$0xff]  ;;  %v149_v3 = vperm.slane %v145_v2, 2  ;;  %v148_v4 = vperm.slane %v145_v2, 1  ;;  %v150_v5 = vperm.slane %v145_v2, 3  ;;  %v147_v10 = vperm.slane %v145_v2, 0 }
  0x3b   :  { %325 = vmatpush.msrb.mxu0 %v301_v23  ;;  %346 = vmatpush.msrb.mxu1 %v298_v26  ;;  %v257_v1 = vld [vmem:[#allocation7] sm:$0xff]  ;;  %v502_v22 = vld [vmem:[#allocation9 + $0x78] sm:$0xff]  ;;  %v501_v23 = vld [vmem:[#allocation9 + $0x70] sm:$0xff] }
  0x3c   :  { %367 = vmatpush.msrb.mxu2 %v295_v20  ;;  %387 = vmatpush.msrb.mxu3 %v296_v21 }
  0x3d   :  { %326 = vmatpush.msrb.mxu0 %v297_v27  ;;  %347 = vmatpush.msrb.mxu1 %v294_v30 }
  0x3e   :  { %368 = vmatpush.msrb.mxu2 %v291_v24  ;;  %388 = vmatpush.msrb.mxu3 %v292_v25 }
  0x3f   :  { %327 = vmatpush.msrb.mxu0 %v293_v31  ;;  %348 = vmatpush.msrb.mxu1 %v290_v34 }
  0x40   :  { %369 = vmatpush.msrb.mxu2 %v287_v28  ;;  %389 = vmatpush.msrb.mxu3 %v288_v29  ;;  %v500_v28 = vld [vmem:[#allocation9 + $0x68] sm:$0xff] }
  0x41   :  { %211 = vmatmul.f32.vlgmr.msra.gmra.mxu2 %v80_v35  ;;  %231 = vmatmul.f32.vlgmr.msra.gmra.mxu3 %v80_v35 }
  0x42   :  { %370 = vmatpush.msrb.mxu2 %v283_v32  ;;  %390 = vmatpush.msrb.mxu3 %v284_v33  ;;  %v499_v32 = vld [vmem:[#allocation9 + $0x60] sm:$0xff] }
  0x43   :  { %328 = vmatpush.msrb.mxu0 %v289_v38  ;;  %349 = vmatpush.msrb.mxu1 %v286_v39  ;;  %v497_v39 = vld [vmem:[#allocation9 + $0x50] sm:$0xff] }
  0x44   :  { %371 = vmatpush.msrb.mxu2 %v279_v36  ;;  %391 = vmatpush.msrb.mxu3 %v280_v37  ;;  %v498_v37 = vld [vmem:[#allocation9 + $0x58] sm:$0xff] }
  0x45   :  { %329 = vmatpush.msrb.mxu0 %v285_v42  ;;  %350 = vmatpush.msrb.mxu1 %v282_v43  ;;  %v496_v43 = vld [vmem:[#allocation9 + $0x48] sm:$0xff] }
  0x46   :  { %372 = vmatpush.msrb.mxu2 %v275_v40  ;;  %392 = vmatpush.msrb.mxu3 %v276_v41 }
  0x47   :  { %330 = vmatpush.msrb.mxu0 %v281_v46  ;;  %351 = vmatpush.msrb.mxu1 %v278_v47  ;;  %v495_v46 = vld [vmem:[#allocation9 + $0x40] sm:$0xff]  ;;  %v494_v47 = vld [vmem:[#allocation9 + $0x38] sm:$0xff] }
  0x48   :  { %373 = vmatpush.msrb.mxu2 %v271_v44  ;;  %393 = vmatpush.msrb.mxu3 %v272_v45 }
  0x49   :  { %191 = vmatmul.f32.vlgmr.msra.gmra.mxu1 %v80_v35  ;;  %331 = vmatpush.msrb.mxu0 %v277_v50 }
  0x4a   :  { %374 = vmatpush.msrb.mxu2 %v267_v48  ;;  %394 = vmatpush.msrb.mxu3 %v268_v49  ;;  %v493_v48 = vld [vmem:[#allocation9 + $0x30] sm:$0xff] }
  0x4b   :  { %352 = vmatpush.msrb.mxu1 %v274_v51  ;;  %171 = vmatmul.f32.vlgmr.msra.gmra.mxu0 %v80_v35  ;;  %v492_v51 = vld [vmem:[#allocation9 + $0x28] sm:$0xff] }
  0x4c   :  { %375 = vmatpush.msrb.mxu2 %v263_v52  ;;  %395 = vmatpush.msrb.mxu3 %v264_v53 }
  0x4d   :  { %353 = vmatpush.msrb.mxu1 %v270_v54  ;;  %332 = vmatpush.msrb.mxu0 %v273_v55  ;;  %v491_v54 = vld [vmem:[#allocation9 + $0x20] sm:$0xff] }
  0x4e   :  { %376 = vmatpush.msrb.mxu2 %v259_v56  ;;  %396 = vmatpush.msrb.mxu3 %v260_v57  ;;  %v490_v57 = vld [vmem:[#allocation9 + $0x18] sm:$0xff] }
  0x4f   :  { %377 = vmatmul.f32.vlgmr.msrb.gmra.mxu2 %v254_v58  ;;  %397 = vmatmul.f32.vlgmr.msrb.gmra.mxu3 %v254_v58 }
  0x50   :  { %333 = vmatpush.msrb.mxu0 %v269_v59  ;;  %354 = vmatpush.msrb.mxu1 %v266_v60  ;;  %v488_v59 = vld [vmem:[#allocation9 + $0x8] sm:$0xff] }
  0x52   :  { %334 = vmatpush.msrb.mxu0 %v265_v61  ;;  %355 = vmatpush.msrb.mxu1 %v262_v62  ;;  %v487_v61 = vld [vmem:[#allocation9] sm:$0xff] }
  0x54   :  { %335 = vmatpush.msrb.mxu0 %v261_v63  ;;  %356 = vmatpush.msrb.mxu1 %v258_v0 }
  0x55   :  { %357 = vmatmul.f32.vlgmr.msrb.gmra.mxu1 %v254_v58 }
  0x56   :  { %336 = vmatpush.msrb.mxu0 %v257_v1 }
  0x57   :  { %337 = vmatmul.f32.vlgmr.msrb.gmra.mxu0 %v254_v58  ;;  %v489_v58 = vld [vmem:[#allocation9 + $0x10] sm:$0xff] }
  0x58   :  { %504 = vmatpush.msra.mxu0 %v502_v22 }
  0x5a   :  { %505 = vmatpush.msra.mxu0 %v501_v23 }
  0x5c   :  { %506 = vmatpush.msra.mxu0 %v500_v28 }
  0x5e   :  { %507 = vmatpush.msra.mxu0 %v499_v32 }
  0x60   :  { %508 = vmatpush.msra.mxu0 %v498_v37 }
  0x62   :  { %509 = vmatpush.msra.mxu0 %v497_v39 }
  0x64   :  { %510 = vmatpush.msra.mxu0 %v496_v43 }
  0x66   :  { %511 = vmatpush.msra.mxu0 %v495_v46 }
  0x68   :  { %512 = vmatpush.msra.mxu0 %v494_v47 }
  0x6a   :  { %513 = vmatpush.msra.mxu0 %v493_v48 }
  0x6c   :  { %514 = vmatpush.msra.mxu0 %v492_v51 }
  0x6e   :  { %515 = vmatpush.msra.mxu0 %v491_v54 }
  0x70   :  { %516 = vmatpush.msra.mxu0 %v490_v57 }
  0x72   :  { %517 = vmatpush.msra.mxu0 %v489_v58 }
  0x74   :  { %518 = vmatpush.msra.mxu0 %v488_v59 }
  0x76   :  { %519 = vmatpush.msra.mxu0 %v487_v61 }
  0xc4   :  { %v212_v6 = vpop.f32.mrf.mxu2  ;;  %v232_v9 = vpop.f32.mrf.mxu3 }
  0xc5   :  { %v213_v7 = vadd.f32 %v212_v6, %v149_v3  ;;  %v233_v13 = vadd.f32 %v232_v9, %v150_v5 }
  0xc6   :  { %v192_v8 = vpop.f32.mrf.mxu1 }
  0xc7   :  { %v193_v11 = vadd.f32 %v192_v8, %v148_v4  ;;  %v240_v12 = vrot.slane %v213_v7, 6  ;;  %v241_v16 = vrot.slane %v233_v13, 5 }
  0xc8   :  { %v172_v17 = vpop.f32.mrf.mxu0 }
  0xc9   :  { %v239_v15 = vrot.slane %v193_v11, 7  ;;  %v173_v18 = vadd.f32 %v172_v17, %v147_v10  ;;  %v245_v19 = vsel %vm244_vm0, %v240_v12, %v241_v16  ;;  %v255_v17 = vld [vmem:[%s784_s2] sm:$0x1] }
  0xcb   :  { %v243_v20 = vsel %vm242_vm1, %v173_v18, %v239_v15 }
  0xcc   :  { %v247_v21 = vsel %vm246_vm2, %v243_v20, %v245_v19 }
  0xcd   :  { %253 = vst.msk [vmem:[#allocation2] sm:$0xf] %vm251_vm3, %v247_v21 }
  0xd2   :  { %v378_v24 = vpop.f32.mrf.mxu2  ;;  %v358_v25 = vpop.f32.mrf.mxu1 }
  0xd3   :  { %v406_v26 = vrot.slane %v378_v24, 6  ;;  %v398_v27 = vpop.f32.mrf.mxu3  ;;  %v405_v29 = vrot.slane %v358_v25, 7 }
  0xd4   :  { %v407_v30 = vrot.slane %v398_v27, 5  ;;  %v338_v31 = vpop.f32.mrf.mxu0  ;;  %v256_v34 = vld [vmem:[#allocation2] sm:$0xf] }
  0xd5   :  { %v408_v35 = vsel %vm242_vm1, %v338_v31, %v405_v29 }
  0xd6   :  { %v409_v33 = vsel %vm244_vm0, %v406_v26, %v407_v30 }
  0xd7   :  { %v410_v36 = vsel %vm246_vm2, %v408_v35, %v409_v33 }
  0xd8   :  { %v412_v38 = vadd.f32 %v410_v36, %v256_v34  ;;  %v503_v36 = vld [vmem:[%s789_s7] sm:$0x1] }
  0xda   :  { %v551_v40 = vmul.f32 -1.442695, %v412_v38  ;;  %v433_v41 = vrot.slane %v412_v38, 1  ;;  %v457_v42 = vrot.slane %v412_v38, 3  ;;  %v454_v1 = vrot.slane %v412_v38, 2 }
  0xdc   :  { %562 = vpow2.f32 %v551_v40  ;;  %v552_v44 = vmul.f32 -1.442695, %v433_v41  ;;  %v553_v45 = vmul.f32 -1.442695, %v457_v42 }
  0xde   :  { %564 = vpow2.f32 %v552_v44 }
  0xdf   :  { %566 = vpow2.f32 %v553_v45 }
  0xe2   :  { %v563_v49 = vpop.eup %562 }
  0xe3   :  { %v416_v50 = vadd.f32 1.0, %v563_v49 }
  0xe4   :  { %v565_v52 = vpop.eup %564 }
  0xe5   :  { %v567_v53 = vpop.eup %566  ;;  %568 = vrcp.f32 %v416_v50  ;;  %v438_v55 = vadd.f32 1.0, %v565_v52  ;;  %v428_v5 = vand.u32 2147483648, %v416_v50  ;;  %v426_v7 = vand.u32 2147483647, %v416_v50 }
  0xe6   :  { %v462_v56 = vadd.f32 1.0, %v567_v53  ;;  %vm422_vm5 = vweird.f32 %v416_v50 }
  0xe7   :  { %570 = vrcp.f32 %v438_v55  ;;  %v450_v10 = vand.u32 2147483648, %v438_v55  ;;  %v448_v12 = vand.u32 2147483647, %v438_v55  ;;  %v429_v14 = vor.u32 1.1754944e-38, %v428_v5 }
  0xe8   :  { %572 = vrcp.f32 %v462_v56  ;;  %vm427_vm8 = vcmp.eq.f32.partialorder %v426_v7, 8.507059e+37  ;;  %vm444_vm9 = vweird.f32 %v438_v55  ;;  %v474_v28 = vand.u32 2147483648, %v462_v56 }
  0xe9   :  { %574 = vtanh.f32 %v454_v1  ;;  %v451_v19 = vor.u32 1.1754944e-38, %v450_v10  ;;  %vm449_vm11 = vcmp.eq.f32.partialorder %v448_v12, 8.507059e+37  ;;  %vm468_vm13 = vweird.f32 %v462_v56 }
  0xea   :  { %v472_v29 = vand.u32 2147483647, %v462_v56  ;;  %v475_v31 = vor.u32 1.1754944e-38, %v474_v28 }
  0xeb   :  { %v569_v60 = vpop.eup %568 }
  0xec   :  { %v418_v62 = vmul.f32 %v569_v60, %v416_v50  ;;  %vm423_vm4 = vweird.f32 %v569_v60  ;;  %vm473_vm15 = vcmp.eq.f32.partialorder %v472_v29, 8.507059e+37 }
  0xed   :  { %v571_v63 = vpop.eup %570  ;;  %vm424_vm6 = vmor %vm422_vm5, %vm423_vm4 }
  0xee   :  { %v419_v0 = vsub.f32 1.0, %v418_v62  ;;  %v573_v2 = vpop.eup %572  ;;  %v440_v3 = vmul.f32 %v571_v63, %v438_v55  ;;  %vm445_vm7 = vweird.f32 %v571_v63 }
  0xef   :  { %v464_v6 = vmul.f32 %v573_v2, %v462_v56  ;;  %vm446_vm10 = vmor %vm444_vm9, %vm445_vm7  ;;  %v575_v21 = vpop.eup %574  ;;  %vm469_vm12 = vweird.f32 %v573_v2 }
  0xf0   :  { %v420_v4 = vmul.f32 %v569_v60, %v419_v0  ;;  %v441_v8 = vsub.f32 1.0, %v440_v3  ;;  %vm470_vm14 = vmor %vm468_vm13, %vm469_vm12 }
  0xf1   :  { %v465_v15 = vsub.f32 1.0, %v464_v6 }
  0xf2   :  { %v421_v9 = vadd.f32 %v569_v60, %v420_v4  ;;  %v442_v11 = vmul.f32 %v571_v63, %v441_v8 }
  0xf3   :  { %v466_v23 = vmul.f32 %v573_v2, %v465_v15 }
  0xf4   :  { %v425_v13 = vsel %vm424_vm6, %v569_v60, %v421_v9  ;;  %v443_v16 = vadd.f32 %v571_v63, %v442_v11 }
  0xf5   :  { %v430_v18 = vsel %vm427_vm8, %v429_v14, %v425_v13  ;;  %v467_v27 = vadd.f32 %v573_v2, %v466_v23 }
  0xf6   :  { %v447_v20 = vsel %vm446_vm10, %v571_v63, %v443_v16  ;;  %v479_v25 = vmul.f32 %v575_v21, %v430_v18 }
  0xf7   :  { %v452_v22 = vsel %vm449_vm11, %v451_v19, %v447_v20  ;;  %v471_v30 = vsel %vm470_vm14, %v573_v2, %v467_v27 }
  0xf8   :  { %v478_v24 = vmul.f32 %v452_v22, %v255_v17  ;;  %v476_v33 = vsel %vm473_vm15, %v475_v31, %v471_v30 }
  0xfa   :  { %v480_v26 = vadd.f32 %v479_v25, %v478_v24 }
  0xfc   :  { %576 = vtanh.f32 %v480_v26  ;;  %485 = vst [vmem:[%s792_s10] sm:$0x1] %v480_v26  ;;  %s687_s10 = smov [#allocation10]  }
  0xfd   :  { %s530_s19 = sshll.u32 %s687_s10, 4  ;;  %s531_s19 = int_to_ptr.vmem [resolvable:$true] %s530_s19 }
 0x102   :  { %v577_v32 = vpop.eup %576 }
 0x103   :  { %v482_v34 = vmul.f32 %v577_v32, %v476_v33 }
 0x105   :  { %483 = vst [vmem:[#allocation3] sm:$0x1] %v482_v34 }
 0x106   :  { %484 = vst [vmem:[%s791_s9] sm:$0x1] %v482_v34 }
 0x10c   :  { %v486_v35 = vld [vmem:[#allocation3] sm:$0x1] }
 0x10d   :  { %520 = vmatmul.f32.vlgmr.msra.gmra.mxu0 %v486_v35 }
 0x18a   :  { %v521_v37 = vpop.f32.mrf.mxu0 }
 0x18b   :  { %v522_v38 = vadd.f32 %v521_v37, %v503_v36 }
 0x18d   :  { %524 = vst [vmem:[#allocation10] sm:$0x1] %v522_v38 }
 0x18e   :  { %535 = dma.vmem_to_hbm [thread:$0]  %s531_s19, 16, %s533_s22, [#allocation6]  }
 0x18f   :  { %678 = dma.done.wait [#allocation6], 16  }
 0x190   :  { %679 = vsyncadd [#allocation6], 4294967280 }
 0x191   :  { %548 = vsyncpa [#allocation5], 1 }
 0x192   :  { %549 = vsyncpa [#allocation8], 1 }
 0x193   :  { %550 = vsyncpa [#allocation6], 1 }

</bundles_post_ra>
